<compile_context>
chip_gen: v7x
topology: tpu7x:2x2x1
jax: 0.10.0
libtpu: 0.0.40
codegen_flags: <defaults>
</compile_context>

<pallas_src>
import jax
import jax.numpy as jnp
import numpy as np
from jax.experimental import pallas as pl
from jax.experimental.pallas import tpu as pltpu


def _round_up(x, m):
    return ((x + m - 1) // m) * m


def _make_kernel(n_rows, n_feat, k_tile, needs_k_mask, use_bf16_matmul):
    n_rows_f = float(n_rows)

    def kernel(x_ref, stats_ref, w_ref, b_ref, out_ref, acc_ref):
        # x_ref    : (tm, tk)     rows x feature-chunk of the flattened input
        # stats_ref: (2, tk)      row 0 = mu (column mean), row 1 = sum_j (x-mu)^2
        # w_ref    : (tk, O_pad)  lane-padded weight K-slab, MXU-native layout
        # b_ref    : (1, O_pad)   lane-padded bias (resident)
        # out_ref  : (tm, O_pad)  resident across the K axis
        # acc_ref  : (tm, O_pad)  f32 accumulator scratch
        k = pl.program_id(1)

        @pl.when(k == 0)
        def _init():
            acc_ref[...] = jnp.zeros_like(acc_ref)

        x = x_ref[...]
        stats = stats_ref[...]
        mu = stats[0:1, :]
        s2c = stats[1:2, :]

        # sum_j (x_j - x_i)^2 == S2c + B*(x_i - mu)^2 ; both terms >= 0 by
        # construction, so no cancellation and no clamp is needed.
        xc = x - mu
        sq_sum = s2c + n_rows_f * (xc * xc)

        # Exact PyTorch eps placement: log(sqrt(.) + 1e-6), all in f32.
        dist = jnp.log(jnp.sqrt(sq_sum) + 1e-6)

        if needs_k_mask:
            # Ragged last K block: zero the columns past F so garbage x reads
            # contribute exactly 0 to the contraction (W rows there are 0 too).
            col = jax.lax.broadcasted_iota(jnp.int32, dist.shape, 1)
            dist = jnp.where(col < (n_feat - k * k_tile), dist, 0.0)

        if use_bf16_matmul:
            dist = dist.astype(jnp.bfloat16)  # W is already bf16 (hoisted cast)

        acc_ref[...] += jnp.dot(dist, w_ref[...],
                                preferred_element_type=jnp.float32)

        @pl.when(k == pl.num_programs(1) - 1)
        def _finish():
            out_ref[...] = acc_ref[...] + b_ref[...]  # lane-dense store

    return kernel


def distance_discriminator(data, weight, bias, *, use_bf16_matmul=False,
                           row_tile=512, max_k_tile=1024):
    """data: (B, ...) any trailing dims; weight: (out_size, batch_size); bias: (out_size,)."""
    B = data.shape[0]
    x = data.reshape(B, -1).astype(jnp.float32)               # (B, F)  glue reshape
    F = x.shape[1]
    out_size, in_features = weight.shape
    assert F == in_features, (
        "DistanceDiscriminator requires flattened feature count == batch_size "
        f"(got F={F}, batch_size={in_features})")

    # --- per-column statistics (replace the O(B^2*F) pairwise tensor) -------
    # TODO(synk): for tiny B*F these two reductions could move into a fully
    # resident single-pass kernel to save one HBM read of x.
    mu = jnp.mean(x, axis=0, keepdims=True)                    # (1, F)
    s2c = jnp.sum(jnp.square(x - mu), axis=0, keepdims=True)   # (1, F)

    # --- tiling -------------------------------------------------------------
    o_pad = _round_up(out_size, 128)                           # lane-dense N
    if F <= max_k_tile:
        tk = F                                                 # full-dim block
    else:
        tk = max(128, (int(max_k_tile) // 128) * 128)          # 128-aligned K tile
    f_pad = _round_up(F, tk)
    nk = f_pad // tk
    needs_k_mask = (f_pad != F)

    # Weight: single padding copy fuses transpose + lane pad + (optional) bf16
    # cast; K dim zero-padded to f_pad so ragged K slabs multiply by exact 0.
    w_dtype = jnp.bfloat16 if use_bf16_matmul else jnp.float32
    w_bytes = 2 if use_bf16_matmul else 4
    w_pad = jnp.zeros((f_pad, o_pad), w_dtype)
    w_pad = w_pad.at[:F, :out_size].set(weight.T.astype(w_dtype))
    b_pad = jnp.zeros((1, o_pad), jnp.float32)
    b_pad = b_pad.at[0, :out_size].set(bias.astype(jnp.float32))

    # Column stats packed into a single small (2, f_pad) resident input.
    stats = jnp.zeros((2, f_pad), jnp.float32)
    stats = stats.at[0, :F].set(mu[0])
    stats = stats.at[1, :F].set(s2c[0])

    # Row tile: multiple of 8; shrink until the per-step VMEM footprint fits.
    tm = min(_round_up(int(row_tile), 8), _round_up(B, 8))

    def footprint(tm_):
        blk = (tm_ * tk * 4            # x block
               + 2 * tk * 4            # stats block
               + tk * o_pad * w_bytes  # W slab
               + o_pad * 4             # bias
               + tm_ * o_pad * 4)      # output block
        return 2 * blk + tm_ * o_pad * 4   # double-buffered pipeline + accumulator

    while footprint(tm) > (24 << 20) and tm > 8:
        tm = max(8, _round_up(tm // 2, 8))

    nb = pl.cdiv(B, tm)   # ragged last row block: extra rows computed then discarded
    vmem_limit = int(min(64 << 20, max(16 << 20, 2 * footprint(tm) + (4 << 20))))

    kernel = _make_kernel(B, F, tk, needs_k_mask, use_bf16_matmul)

    cost = pl.CostEstimate(
        flops=2 * B * f_pad * o_pad + 6 * B * F,
        transcendentals=2 * B * F,                            # sqrt + log per element
        bytes_accessed=(B * F * 4 + f_pad * o_pad * w_bytes
                        + B * o_pad * 4 + 2 * f_pad * 4 + o_pad * 4),
    )

    out_padded = pl.pallas_call(
        kernel,
        out_shape=jax.ShapeDtypeStruct((B, o_pad), jnp.float32),
        grid=(nb, nk),
        in_specs=[
            pl.BlockSpec((tm, tk), lambda i, k: (i, k)),       # x row/feature block
            pl.BlockSpec((2, tk), lambda i, k: (0, k)),        # packed mu / S2c
            pl.BlockSpec((tk, o_pad), lambda i, k: (k, 0)),    # W K-slab
            pl.BlockSpec((1, o_pad), lambda i, k: (0, 0)),     # bias (resident)
        ],
        out_specs=pl.BlockSpec((tm, o_pad), lambda i, k: (i, 0)),  # resident across k
        scratch_shapes=[pltpu.VMEM((tm, o_pad), jnp.float32)],
        compiler_params=pltpu.CompilerParams(
            dimension_semantics=("parallel", "arbitrary"),
            vmem_limit_bytes=vmem_limit,
        ),
        cost_estimate=cost,
    )(x, stats, w_pad, b_pad)

    return out_padded[:, :out_size]


def _reference(data, weight, bias):
    """Float64 numpy reference with the exact PyTorch formula."""
    d = np.asarray(data, np.float64).reshape(data.shape[0], -1)
    diff = d[None, :, :] - d[:, None, :]                      # (B, B, F)
    dist = np.log(np.sqrt(np.sum(diff * diff, axis=1)) + 1e-6)
    return dist @ np.asarray(weight, np.float64).T + np.asarray(bias, np.float64)


if __name__ == "__main__":
    key = jax.random.PRNGKey(0)
    k1, k2, k3, k4, k5, k6 = jax.random.split(key, 6)

    # --- case 1: toy shape (batch_size = 8, data (8,2,2,2) -> F = 8 == batch_size) ---
    B1, O1 = 8, 16
    data1 = jax.random.normal(k1, (B1, 2, 2, 2), dtype=jnp.float32)
    bound1 = 1.0 / np.sqrt(B1)
    w1 = jax.random.uniform(k2, (O1, B1), jnp.float32, -bound1, bound1)
    b1 = jax.random.uniform(k3, (O1,), jnp.float32, -bound1, bound1)

    out1 = jax.block_until_ready(distance_discriminator(data1, w1, b1))
    ref1 = _reference(data1, w1, b1)
    np.testing.assert_allclose(np.asarray(out1), ref1, rtol=1e-4, atol=1e-4)

    # bf16-MXU-operand variant (optional fast path on v5e/v6e/v7x); accumulation
    # and the dist epilogue stay f32.
    out1_bf16 = jax.block_until_ready(
        distance_discriminator(data1, w1, b1, use_bf16_matmul=True))
    np.testing.assert_allclose(np.asarray(out1_bf16), ref1, rtol=5e-2, atol=5e-2)

    # --- case 2: exercises ragged row blocks, K-split over features, ragged-K
    #             masking, lane padding, and the accumulator pattern. ---
    B2, O2 = 200, 10
    data2 = jax.random.normal(k4, (B2, 10, 20), dtype=jnp.float32)    # F = 200 == B2
    bound2 = 1.0 / np.sqrt(B2)
    w2 = jax.random.uniform(k5, (O2, B2), jnp.float32, -bound2, bound2)
    b2 = jax.random.uniform(k6, (O2,), jnp.float32, -bound2, bound2)

    out2 = jax.block_until_ready(
        distance_discriminator(data2, w2, b2, row_tile=64, max_k_tile=128))
    ref2 = _reference(data2, w2, b2)
    np.testing.assert_allclose(np.asarray(out2), ref2, rtol=1e-4, atol=1e-4)

    print("KERNEL_OK")
</pallas_src>

<mosaic_0001>
module attributes {stable_mosaic.version = 11 : i64} {
  func.func @kernel(%arg0: i32, %arg1: i32, %arg2: memref<8x8xf32, #tpu.memory_space<vmem>>, %arg3: memref<2x8xf32, #tpu.memory_space<vmem>>, %arg4: memref<8x128xf32, #tpu.memory_space<vmem>>, %arg5: memref<1x128xf32, #tpu.memory_space<vmem>>, %arg6: memref<8x128xf32, #tpu.memory_space<vmem>>, %arg7: memref<8x128xf32, #tpu.memory_space<vmem>>) attributes {dimension_semantics = [#tpu.dimension_semantics<parallel>, #tpu.dimension_semantics<arbitrary>], iteration_bounds = array<i64: 1, 1>, scalar_prefetch = 0 : i64, scratch_operands = 1 : i64, tpu.core_type = #tpu.core_type<tc>, window_params = [{transform_indices = @transform_0, window_bounds = array<i64: 8, 8>}, {transform_indices = @transform_1, window_bounds = array<i64: 2, 8>}, {transform_indices = @transform_2, window_bounds = array<i64: 8, 128>}, {pipeline_mode = #tpu.pipeline_mode<synchronous>, transform_indices = @transform_3, window_bounds = array<i64: 1, 128>}, {transform_indices = @transform_4, window_bounds = array<i64: 8, 128>}]} {
    %c0_i32 = arith.constant 0 : i32
    %0 = arith.cmpi eq, %arg1, %c0_i32 : i32
    %1 = arith.extui %0 : i1 to i32
    %c0_i32_0 = arith.constant 0 : i32
    %2 = arith.cmpi ne, %1, %c0_i32_0 : i32
    scf.if %2 {
      %cst_14 = arith.constant 0.000000e+00 : f32
      %26 = vector.broadcast %cst_14 : f32 to vector<8x128xf32>
      %c0_15 = arith.constant 0 : index
      %c0_16 = arith.constant 0 : index
      %27 = vector.load %arg7[%c0_15, %c0_16] : memref<8x128xf32, #tpu.memory_space<vmem>>, vector<8x128xf32>
      tpu.vector_store %arg7[%c0_15, %c0_16], %26 {strides = array<i32>} : memref<8x128xf32, #tpu.memory_space<vmem>>, vector<8x128xf32>,
    } else {
    }
    %c0 = arith.constant 0 : index
    %c0_1 = arith.constant 0 : index
    %3 = vector.load %arg2[%c0, %c0_1] : memref<8x8xf32, #tpu.memory_space<vmem>>, vector<8x8xf32>
    %c0_2 = arith.constant 0 : index
    %c0_3 = arith.constant 0 : index
    %4 = vector.load %arg3[%c0_2, %c0_3] : memref<2x8xf32, #tpu.memory_space<vmem>>, vector<2x8xf32>
    %5 = vector.extract_strided_slice %4 {offsets = [0, 0], sizes = [1, 8], strides = [1, 1]} : vector<2x8xf32> to vector<1x8xf32>
    %6 = vector.extract_strided_slice %4 {offsets = [1, 0], sizes = [1, 8], strides = [1, 1]} : vector<2x8xf32> to vector<1x8xf32>
    %7 = vector.broadcast %5 : vector<1x8xf32> to vector<8x8xf32>
    %8 = arith.subf %3, %7 : vector<8x8xf32>
    %9 = arith.mulf %8, %8 : vector<8x8xf32>
    %cst = arith.constant 8.000000e+00 : f32
    %10 = vector.broadcast %cst : f32 to vector<8x8xf32>
    %11 = arith.mulf %10, %9 : vector<8x8xf32>
    %12 = vector.broadcast %6 : vector<1x8xf32> to vector<8x8xf32>
    %13 = arith.addf %12, %11 : vector<8x8xf32>
    %14 = math.sqrt %13 : vector<8x8xf32>
    %cst_4 = arith.constant 9.99999997E-7 : f32
    %15 = vector.broadcast %cst_4 : f32 to vector<8x8xf32>
    %16 = arith.addf %14, %15 : vector<8x8xf32>
    %17 = math.log %16 : vector<8x8xf32>
    %c0_5 = arith.constant 0 : index
    %c0_6 = arith.constant 0 : index
    %18 = vector.load %arg7[%c0_5, %c0_6] : memref<8x128xf32, #tpu.memory_space<vmem>>, vector<8x128xf32>
    %c0_7 = arith.constant 0 : index
    %c0_8 = arith.constant 0 : index
    %19 = vector.load %arg4[%c0_7, %c0_8] : memref<8x128xf32, #tpu.memory_space<vmem>>, vector<8x128xf32>
    %cst_9 = arith.constant dense<0.000000e+00> : vector<8x128xf32>
    %20 = tpu.matmul %17, %19, %cst_9 {dimension_numbers = #tpu.dot_dimension_numbers<[1], [0], [0], [1], [0, 0, 1, 1], [], []>} : vector<8x8xf32>, vector<8x128xf32>, vector<8x128xf32> -> vector<8x128xf32>
    %21 = arith.addf %18, %20 : vector<8x128xf32>
    %c0_10 = arith.constant 0 : index
    %c0_11 = arith.constant 0 : index
    %22 = vector.load %arg7[%c0_10, %c0_11] : memref<8x128xf32, #tpu.memory_space<vmem>>, vector<8x128xf32>
    tpu.vector_store %arg7[%c0_10, %c0_11], %21 {strides = array<i32>} : memref<8x128xf32, #tpu.memory_space<vmem>>, vector<8x128xf32>,
    %c0_i32_12 = arith.constant 0 : i32
    %23 = arith.cmpi eq, %arg1, %c0_i32_12 : i32
    %24 = arith.extui %23 : i1 to i32
    %c0_i32_13 = arith.constant 0 : i32
    %25 = arith.cmpi ne, %24, %c0_i32_13 : i32
    scf.if %25 {
      %c0_14 = arith.constant 0 : index
      %c0_15 = arith.constant 0 : index
      %26 = vector.load %arg7[%c0_14, %c0_15] : memref<8x128xf32, #tpu.memory_space<vmem>>, vector<8x128xf32>
      %c0_16 = arith.constant 0 : index
      %c0_17 = arith.constant 0 : index
      %27 = vector.load %arg5[%c0_16, %c0_17] : memref<1x128xf32, #tpu.memory_space<vmem>>, vector<1x128xf32>
      %28 = vector.broadcast %27 : vector<1x128xf32> to vector<8x128xf32>
      %29 = arith.addf %26, %28 : vector<8x128xf32>
      %c0_18 = arith.constant 0 : index
      %c0_19 = arith.constant 0 : index
      %30 = vector.load %arg6[%c0_18, %c0_19] : memref<8x128xf32, #tpu.memory_space<vmem>>, vector<8x128xf32>
      tpu.vector_store %arg6[%c0_18, %c0_19], %29 {strides = array<i32>} : memref<8x128xf32, #tpu.memory_space<vmem>>, vector<8x128xf32>,
    } else {
    }
    return
  }
  func.func @transform_0(%arg0: i32, %arg1: i32) -> (i32, i32) {
    %c0_i32 = arith.constant 0 : i32
    return %arg0, %arg1 : i32, i32
  }
  func.func @transform_1(%arg0: i32, %arg1: i32) -> (i32, i32) {
    %c0_i32 = arith.constant 0 : i32
    %c0_i32_0 = arith.constant 0 : i32
    return %c0_i32, %arg1 : i32, i32
  }
  func.func @transform_2(%arg0: i32, %arg1: i32) -> (i32, i32) {
    %c0_i32 = arith.constant 0 : i32
    %c0_i32_0 = arith.constant 0 : i32
    return %arg1, %c0_i32 : i32, i32
  }
  func.func @transform_3(%arg0: i32, %arg1: i32) -> (i32, i32) {
    %c0_i32 = arith.constant 0 : i32
    %c0_i32_0 = arith.constant 0 : i32
    %c0_i32_1 = arith.constant 0 : i32
    return %c0_i32, %c0_i32_0 : i32, i32
  }
  func.func @transform_4(%arg0: i32, %arg1: i32) -> (i32, i32) {
    %c0_i32 = arith.constant 0 : i32
    %c0_i32_0 = arith.constant 0 : i32
    return %arg0, %c0_i32 : i32, i32
  }
}

</mosaic_0001>

<bundles_post_ra>
// kernel: tpu_custom_call.1
= control target key start
LH: loop header
LB: loop body
LE: loop exit
PB: predicated region body
PF: predicated region fallthrough
CT: control target
= control target key end

     0   :  { %9 = vsyncpa [#allocation4], 0  ;;  %s340_s0 = inlined_call_operand.hbm [shape: f32[8,8], index: 0, kind: input, shape index: {}]   ;;  %s341_s1 = inlined_call_operand.vmem [shape: f32[2,8], index: 1, kind: input, shape index: {}]   ;;  %s342_s2 = inlined_call_operand.hbm [shape: f32[8,128], index: 2, kind: input, shape index: {}]   ;;  %s343_s3 = inlined_call_operand.vmem [shape: f32[1,128], index: 3, kind: input, shape index: {}]   ;;  %s344_s4 = inlined_call_operand.hbm [shape: f32[8,128], index: 4, kind: output, shape index: {}]  }
   0x1   :  { %10 = vsyncpa [#allocation7], 0 }
   0x2   :  { %11 = vsyncpa [#allocation5], 0  ;;  %s268_s15 = smov [#allocation3]   ;;  %s269_s17 = smov [#allocation6]  }
   0x3   :  { %s18_s16 = sshll.u32 %s268_s15, 4  ;;  %s30_s18 = sshll.u32 %s269_s17, 4  ;;  %s19_s16 = int_to_ptr.vmem [resolvable:$true] %s18_s16  ;;  %s31_s18 = int_to_ptr.vmem [resolvable:$true] %s30_s18 }
   0x4   :  { %s196_s21 = scalar_lea.hbm %s340_s0, 128 }
   0x5   :  { %p197_p0 = scmp.ne.s32.totalorder %s340_s0, %s196_s21  ;;  %p200_p1 = scmp.lt.u32.totalorder %s196_s21, %s340_s0 }
   0x7   :  { %p202_p2 = pnand %p200_p1, %p197_p0 }
   0x9   :  { %205 = shalt.err (!%p202_p2)
}
   0xa   :  { %s206_s26 = scalar_lea.vmem %s19_s16, 128  ;;  %p211_p4 = scmp.lt.s32.totalorder %s19_s16, %s19_s16 }
   0xb   :  { %p207_p3 = scmp.ne.s32.totalorder %s19_s16, %s206_s26  ;;  %p212_p5 = scmp.lt.s32.totalorder %s206_s26, %s206_s26 }
   0xd   :  { %p213_p6 = por %p212_p5, %p211_p4 }
   0xf   :  { %p214_p7 = pnand %p213_p6, %p207_p3 }
  0x11   :  { %217 = shalt.err (!%p214_p7)
}
  0x12   :  { %21 = dma.hbm_to_vmem [thread:$0]  %s340_s0, 128, %s19_s16, [#allocation4]  }
  0x13   :  { %s218_s5 = scalar_lea.hbm %s342_s2, 128 }
  0x14   :  { %p219_p8 = scmp.ne.s32.totalorder %s342_s2, %s218_s5  ;;  %p222_p9 = scmp.lt.u32.totalorder %s218_s5, %s342_s2 }
  0x16   :  { %p224_p10 = pnand %p222_p9, %p219_p8 }
  0x18   :  { %227 = shalt.err (!%p224_p10)
}
  0x19   :  { %s228_s10 = scalar_lea.vmem %s31_s18, 128  ;;  %p233_p12 = scmp.lt.s32.totalorder %s31_s18, %s31_s18 }
  0x1a   :  { %p229_p11 = scmp.ne.s32.totalorder %s31_s18, %s228_s10  ;;  %p234_p13 = scmp.lt.s32.totalorder %s228_s10, %s228_s10 }
  0x1c   :  { %p235_p0 = por %p234_p13, %p233_p12 }
  0x1e   :  { %p236_p1 = pnand %p235_p0, %p229_p11 }
  0x20   :  { %239 = shalt.err (!%p236_p1)
}
  0x21   :  { %33 = dma.hbm_to_vmem [thread:$0]  %s342_s2, 128, %s31_s18, [#allocation7]  }
  0x22   :  { %262 = dma.done.wait [#allocation4], 128  }
  0x23   :  { %263 = vsyncadd [#allocation4], 4294967168 }
  0x24   :  { %264 = dma.done.wait [#allocation7], 128  }
  0x25   :  { %265 = vsyncadd [#allocation7], 4294967168  ;;  %v49_v0 = vlaneseq  ;;  %v270_v1 = vmov 0.0   ;;  %vm271_vm0 = vmmov 0   ;;  %v72_v4 = vld [vmem:[#allocation6] sm:$0xff]  ;;  %v47_v5 = vld [vmem:[#allocation3] sm:$0xff] }
  0x26   :  { %182 = vmatprep.subr.mxu0 %v270_v1  ;;  %184 = vmatprep.mubr.msk.f32.mxu0 %vm271_vm0, %v270_v1  ;;  %v48_v6 = vld [vmem:[%s341_s1] sm:$0x3]  ;;  %vm73_vm3 = vcmask 64512   ;;  %s272_s14 = smov [#allocation8]  }
  0x27   :  { %v50_v2 = vshrl.u32 %v49_v0, 7  ;;  %183 = vmatpush3.msra.mxu0 %v72_v4  ;;  %v179_v22 = vld [vmem:[%s343_s3] ss:$0 sm:$0xff]  ;;  %s168_s15 = sshll.u32 %s272_s14, 4  ;;  %s169_s15 = int_to_ptr.vmem [resolvable:$true] %s168_s15 }
  0x28   :  { %s240_s16 = scalar_lea.vmem %s169_s15, 128  ;;  %p245_p3 = scmp.lt.s32.totalorder %s169_s15, %s169_s15 }
  0x29   :  { %v51_v3 = vsub.s32 0, %v50_v2  ;;  %v58_v8 = vsub.s32 1, %v50_v2  ;;  %p241_p2 = scmp.ne.s32.totalorder %s169_s15, %s240_s16  ;;  %p246_p4 = scmp.lt.s32.totalorder %s240_s16, %s240_s16 }
  0x2b   :  { %v52_v7 = vrot.slane %v48_v6, %v51_v3  ;;  %v59_v11 = vrot.slane %v48_v6, %v58_v8  ;;  %p247_p5 = por %p246_p4, %p245_p3 }
  0x2d   :  { %v53_v9 = vsub.f32 %v47_v5, %v52_v7  ;;  %p248_p6 = pnand %p247_p5, %p241_p2 }
  0x2f   :  { %v54_v10 = vmul.f32 %v53_v9, %v53_v9 }
  0x31   :  { %v55_v12 = vmul.f32 8.0, %v54_v10 }
  0x33   :  { %v60_v13 = vadd.f32 %v59_v11, %v55_v12 }
  0x35   :  { %192 = vrsqrt.f32 %v60_v13  ;;  %vm63_vm1 = vcmp.eq.f32.partialorder %v60_v13, inf  ;;  %v66_v15 = vand.u32 2147483648, %v60_v13  ;;  %vm65_vm2 = vcmp.eq.f32.partialorder %v60_v13, 0.0 }
  0x3f   :  { %v193_v14 = vpop.eup %192 }
  0x40   :  { %v62_v16 = vmul.f32 %v193_v14, %v60_v13 }
  0x42   :  { %v64_v17 = vsel %vm63_vm1, %v60_v13, %v62_v16 }
  0x43   :  { %v67_v18 = vsel %vm65_vm2, %v66_v15, %v64_v17 }
  0x44   :  { %v68_v19 = vadd.f32 1e-06, %v67_v18 }
  0x46   :  { %194 = vlog2.f32 %v68_v19 }
  0x50   :  { %v195_v20 = vpop.eup %194 }
  0x51   :  { %v70_v21 = vmul.f32 0.6931472, %v195_v20 }
  0x53   :  { %185 = vmatmul.mubr.msk.f32.vlgmr.msra.gmra.mrb[0].mxu0 %vm73_vm3, %v70_v21 }
 0x126   :  { %v143_v23 = vpop.f32.mrb[0].mxu0 }
 0x127   :  { %v160_v24 = vadd.f32 %v179_v22, %v143_v23  ;;  %v186_v25 = vpop.f32.mrb[1].mxu0 }
 0x129   :  { %161 = vst [vmem:[#allocation8] sm:$0xff] %v160_v24 }
 0x12a   :  { %251 = shalt.err (!%p248_p6)
}
 0x12b   :  { %s252_s19 = scalar_lea.hbm %s344_s4, 128 }
 0x12c   :  { %p253_p7 = scmp.ne.s32.totalorder %s344_s4, %s252_s19  ;;  %p256_p8 = scmp.lt.u32.totalorder %s252_s19, %s344_s4 }
 0x12e   :  { %p258_p9 = pnand %p256_p8, %p253_p7 }
 0x130   :  { %261 = shalt.err (!%p258_p9)
}
 0x131   :  { %171 = dma.vmem_to_hbm [thread:$0]  %s169_s15, 128, %s344_s4, [#allocation5]  }
 0x132   :  { %266 = dma.done.wait [#allocation5], 128  }
 0x133   :  { %267 = vsyncadd [#allocation5], 4294967168 }
 0x134   :  { %175 = vsyncpa [#allocation4], 1 }
 0x135   :  { %176 = vsyncpa [#allocation7], 1 }
 0x136   :  { %177 = vsyncpa [#allocation5], 1 }

</bundles_post_ra>
